<compile_context>
chip_gen: v6e
topology: v6e:2x2x1
jax: 0.10.0
libtpu: 0.0.40
codegen_flags: <defaults>
</compile_context>

<pallas_src>
import functools

import jax
import jax.numpy as jnp
from jax.experimental import pallas as pl
from jax.experimental.pallas import tpu as pltpu


def _temporal_kernel(x_ref, w_ref, b_ref, o_ref, *, T):
    # x_ref: (bb*T, C)  time-major rows for bb whole batches
    # w_ref: (3*C, Np)  fused conv taps [k=-1; k=0; k=+1], Np = lane-padded Cout
    # b_ref: (1, Np)
    # o_ref: (bb, Np)
    R, C = x_ref.shape
    bb = R // T

    x = x_ref[...]                                     # (R, C)

    # Temporal shifts via XLU roll; wrap rows land exactly where the conv's
    # zero padding applies (t==0 / t==T-1 of each batch) and get masked.
    x_m1 = pltpu.roll(x, shift=1, axis=0)              # row t holds x[t-1]
    x_p1 = pltpu.roll(x, shift=R - 1, axis=0)          # row t holds x[t+1]

    t_idx = jax.lax.broadcasted_iota(jnp.int32, (R, 1), 0) % T
    x_m1 = jnp.where(t_idx == 0, 0.0, x_m1)
    x_p1 = jnp.where(t_idx == T - 1, 0.0, x_p1)

    # Three accumulated MXU matmuls (no (R, 3C) concat buffer); f32 accumulate.
    acc = jnp.dot(x, w_ref[C:2 * C, :], preferred_element_type=jnp.float32)
    acc += jnp.dot(x_m1, w_ref[:C, :], preferred_element_type=jnp.float32)
    acc += jnp.dot(x_p1, w_ref[2 * C:, :], preferred_element_type=jnp.float32)

    # AdaptiveMaxPool1d(1) over T first, then bias + ReLU on reduced rows.
    # (T is kept a multiple of 8 in practice so this reshape stays a free,
    # sublane-aligned relayout.)
    m = jnp.max(acc.reshape(bb, T, acc.shape[-1]), axis=1)      # (bb, Np)
    o_ref[...] = jnp.maximum(m + b_ref[...], 0.0)


def _pick_bb(B, T):
    """Batches per grid step: ~1024 rows/tile keeps the DMA pipeline busy.
    bb must divide B and be either B or a multiple of 8 so both the (bb*T, C)
    input block and the (bb, Np) output block stay sublane-aligned."""
    target = max(1, 1024 // max(T, 1))
    if B <= target:
        return B
    cap = min(B, target)
    for bb in range(cap - cap % 8, 0, -8):
        if B % bb == 0:
            return bb
    return B


def simple_temporal_module(x, weight, bias, *, compute_dtype=jnp.float32):
    """x: (B, T, C); weight: (Cout, Cin=C, 3) torch Conv1d layout; bias: (Cout,).

    compute_dtype=jnp.bfloat16 is recommended on v6e/v7x (kernel is HBM-bound);
    accumulation stays f32 either way.
    """
    x = x.astype(jnp.float32)
    B, T, C = x.shape
    Cout = weight.shape[0]

    LANE = 128
    Np = ((Cout + LANE - 1) // LANE) * LANE            # lane-dense output width

    # torch Conv1d weight (Cout, Cin, K) -> fused (K*Cin, Cout): row block k
    # multiplies x[t + k - 1].
    w2d = jnp.transpose(weight, (2, 1, 0)).reshape(3 * C, Cout).astype(jnp.float32)
    w_pad = jnp.zeros((3 * C, Np), jnp.float32).at[:, :Cout].set(w2d)
    b_pad = jnp.zeros((1, Np), jnp.float32).at[:, :Cout].set(bias.astype(jnp.float32))

    x_in = x.reshape(B * T, C).astype(compute_dtype)   # free reshape, no padding copy
    w_in = w_pad.astype(compute_dtype)

    bb = _pick_bb(B, T)
    grid = (B // bb,)

    out = pl.pallas_call(
        functools.partial(_temporal_kernel, T=T),
        out_shape=jax.ShapeDtypeStruct((B, Np), jnp.float32),
        grid=grid,
        in_specs=[
            pl.BlockSpec((bb * T, C), lambda i: (i, 0)),   # x rows for bb batches
            pl.BlockSpec((3 * C, Np), lambda i: (0, 0)),   # full fused weight
            pl.BlockSpec((1, Np), lambda i: (0, 0)),       # bias
        ],
        out_specs=pl.BlockSpec((bb, Np), lambda i: (i, 0)),
        compiler_params=pltpu.CompilerParams(
            dimension_semantics=("parallel",)),            # megacore split on v7x
    )(x_in, w_in, b_pad)
    return out[:, :Cout]


def _reference(x, weight, bias):
    # Pure-JAX reference: conv1d over time (pad=1) + bias, ReLU, max over time.
    x = x.astype(jnp.float32)                      # (B, T, C)
    xt = jnp.transpose(x, (0, 2, 1))               # (B, C, T) == torch permute(0,2,1)
    out = jax.lax.conv_general_dilated(
        xt, weight.astype(jnp.float32),
        window_strides=(1,), padding=((1, 1),),
        dimension_numbers=("NCH", "OIH", "NCH"))
    out = out + bias.reshape(1, -1, 1)
    out = jnp.maximum(out, 0.0)
    return jnp.max(out, axis=-1)                   # (B, Cout)


if __name__ == "__main__":
    B, T, FEATURE_DIM = 2, 8, 32
    COUT = FEATURE_DIM // 4

    key = jax.random.PRNGKey(0)
    kx, kw, kb = jax.random.split(key, 3)

    x = jax.random.normal(kx, (B, T, FEATURE_DIM), dtype=jnp.float32)
    # Deterministic synthetic params (torch Conv1d weight layout: (Cout, Cin, K))
    bound = 1.0 / (FEATURE_DIM * 3) ** 0.5
    weight = jax.random.uniform(kw, (COUT, FEATURE_DIM, 3),
                                minval=-bound, maxval=bound, dtype=jnp.float32)
    bias = jax.random.uniform(kb, (COUT,), minval=-bound, maxval=bound,
                              dtype=jnp.float32)

    out = simple_temporal_module(x, weight, bias)
    out = jax.block_until_ready(out)

    ref = _reference(x, weight, bias)
    assert out.shape == (B, COUT)
    assert jnp.allclose(out, ref, atol=1e-5, rtol=1e-5), "mismatch vs reference"

    print("KERNEL_OK")
</pallas_src>

<mosaic_0001>
module attributes {stable_mosaic.version = 11 : i64} {
  func.func @_temporal_kernel(%arg0: i32, %arg1: memref<16x32xf32, #tpu.memory_space<vmem>>, %arg2: memref<96x128xf32, #tpu.memory_space<vmem>>, %arg3: memref<1x128xf32, #tpu.memory_space<vmem>>, %arg4: memref<2x128xf32, #tpu.memory_space<vmem>>) attributes {dimension_semantics = [#tpu.dimension_semantics<parallel>], iteration_bounds = array<i64: 1>, scalar_prefetch = 0 : i64, scratch_operands = 0 : i64, tpu.core_type = #tpu.core_type<tc>, window_params = [{transform_indices = @transform_0, window_bounds = array<i64: 16, 32>}, {pipeline_mode = #tpu.pipeline_mode<synchronous>, transform_indices = @transform_1, window_bounds = array<i64: 96, 128>}, {pipeline_mode = #tpu.pipeline_mode<synchronous>, transform_indices = @transform_2, window_bounds = array<i64: 1, 128>}, {transform_indices = @transform_3, window_bounds = array<i64: 2, 128>}]} {
    %c0 = arith.constant 0 : index
    %c0_0 = arith.constant 0 : index
    %0 = vector.load %arg1[%c0, %c0_0] : memref<16x32xf32, #tpu.memory_space<vmem>>, vector<16x32xf32>
    %c1_i32 = arith.constant 1 : i32
    %1 = tpu.dynamic_rotate %0 by %c1_i32 dim 0 : vector<16x32xf32>, i32 -> vector<16x32xf32>
    %c15_i32 = arith.constant 15 : i32
    %2 = tpu.dynamic_rotate %0 by %c15_i32 dim 0 : vector<16x32xf32>, i32 -> vector<16x32xf32>
    %3 = tpu.iota {dimensions = array<i32: 0>} : vector<16x1xi32>
    %c8_i32 = arith.constant 8 : i32
    %c0_i32 = arith.constant 0 : i32
    %4 = arith.cmpi eq, %c8_i32, %c0_i32 : i32
    %c1_i32_1 = arith.constant 1 : i32
    %5 = arith.select %4, %c1_i32_1, %c8_i32 : i32
    %6 = vector.broadcast %5 : i32 to vector<16x1xi32>
    %7 = arith.remsi %3, %6 : vector<16x1xi32>
    %c0_i32_2 = arith.constant 0 : i32
    %8 = vector.broadcast %c0_i32_2 : i32 to vector<16x1xi32>
    %9 = arith.cmpi ne, %7, %8 : vector<16x1xi32>
    %c0_i32_3 = arith.constant 0 : i32
    %10 = vector.broadcast %c0_i32_3 : i32 to vector<16x1xi32>
    %11 = arith.cmpi slt, %7, %10 : vector<16x1xi32>
    %c0_i32_4 = arith.constant 0 : i32
    %12 = arith.cmpi slt, %5, %c0_i32_4 : i32
    %13 = vector.broadcast %12 : i1 to vector<16x1xi1>
    %14 = vector.broadcast %13 : vector<16x1xi1> to vector<16x1xi1>
    %15 = arith.xori %11, %14 : vector<16x1xi1>
    %16 = arith.andi %15, %9 : vector<16x1xi1>
    %17 = vector.broadcast %5 : i32 to vector<16x1xi32>
    %18 = arith.addi %7, %17 : vector<16x1xi32>
    %19 = arith.select %16, %18, %7 : vector<16x1xi1>, vector<16x1xi32>
    %c0_i32_5 = arith.constant 0 : i32
    %20 = vector.broadcast %c0_i32_5 : i32 to vector<16x1xi32>
    %21 = arith.cmpi eq, %19, %20 : vector<16x1xi32>
    %cst = arith.constant 0.000000e+00 : f32
    %22 = vector.shape_cast %21 : vector<16x1xi1> to vector<16x1xi1>
    %23 = vector.broadcast %22 : vector<16x1xi1> to vector<16x32xi1>
    %24 = vector.broadcast %cst : f32 to vector<16x32xf32>
    %25 = arith.select %23, %24, %1 : vector<16x32xi1>, vector<16x32xf32>
    %c7_i32 = arith.constant 7 : i32
    %26 = vector.broadcast %c7_i32 : i32 to vector<16x1xi32>
    %27 = arith.cmpi eq, %19, %26 : vector<16x1xi32>
    %cst_6 = arith.constant 0.000000e+00 : f32
    %28 = vector.shape_cast %27 : vector<16x1xi1> to vector<16x1xi1>
    %29 = vector.broadcast %28 : vector<16x1xi1> to vector<16x32xi1>
    %30 = vector.broadcast %cst_6 : f32 to vector<16x32xf32>
    %31 = arith.select %29, %30, %2 : vector<16x32xi1>, vector<16x32xf32>
    %c32 = arith.constant 32 : index
    %c0_7 = arith.constant 0 : index
    %32 = vector.load %arg2[%c32, %c0_7] : memref<96x128xf32, #tpu.memory_space<vmem>>, vector<32x128xf32>
    %cst_8 = arith.constant dense<0.000000e+00> : vector<16x128xf32>
    %33 = tpu.matmul %0, %32, %cst_8 {dimension_numbers = #tpu.dot_dimension_numbers<[1], [0], [0], [1], [0, 0, 1, 1], [], []>} : vector<16x32xf32>, vector<32x128xf32>, vector<16x128xf32> -> vector<16x128xf32>
    %c0_9 = arith.constant 0 : index
    %c0_10 = arith.constant 0 : index
    %34 = vector.load %arg2[%c0_9, %c0_10] : memref<96x128xf32, #tpu.memory_space<vmem>>, vector<32x128xf32>
    %cst_11 = arith.constant dense<0.000000e+00> : vector<16x128xf32>
    %35 = tpu.matmul %25, %34, %cst_11 {dimension_numbers = #tpu.dot_dimension_numbers<[1], [0], [0], [1], [0, 0, 1, 1], [], []>} : vector<16x32xf32>, vector<32x128xf32>, vector<16x128xf32> -> vector<16x128xf32>
    %36 = arith.addf %33, %35 : vector<16x128xf32>
    %c64 = arith.constant 64 : index
    %c0_12 = arith.constant 0 : index
    %37 = vector.load %arg2[%c64, %c0_12] : memref<96x128xf32, #tpu.memory_space<vmem>>, vector<32x128xf32>
    %cst_13 = arith.constant dense<0.000000e+00> : vector<16x128xf32>
    %38 = tpu.matmul %31, %37, %cst_13 {dimension_numbers = #tpu.dot_dimension_numbers<[1], [0], [0], [1], [0, 0, 1, 1], [], []>} : vector<16x32xf32>, vector<32x128xf32>, vector<16x128xf32> -> vector<16x128xf32>
    %39 = arith.addf %36, %38 : vector<16x128xf32>
    %40 = vector.shape_cast %39 : vector<16x128xf32> to vector<2x8x128xf32>
    %cst_14 = arith.constant dense<0xFF800000> : vector<2x128xf32>
    %41 = vector.multi_reduction <maximumf>, %40, %cst_14 [1] : vector<2x8x128xf32> to vector<2x128xf32>
    %c0_15 = arith.constant 0 : index
    %c0_16 = arith.constant 0 : index
    %42 = vector.load %arg3[%c0_15, %c0_16] : memref<1x128xf32, #tpu.memory_space<vmem>>, vector<1x128xf32>
    %43 = vector.broadcast %42 : vector<1x128xf32> to vector<2x128xf32>
    %44 = arith.addf %41, %43 : vector<2x128xf32>
    %cst_17 = arith.constant 0.000000e+00 : f32
    %45 = vector.broadcast %cst_17 : f32 to vector<2x128xf32>
    %46 = arith.maximumf %44, %45 : vector<2x128xf32>
    %c0_18 = arith.constant 0 : index
    %c0_19 = arith.constant 0 : index
    %47 = vector.load %arg4[%c0_18, %c0_19] : memref<2x128xf32, #tpu.memory_space<vmem>>, vector<2x128xf32>
    tpu.vector_store %arg4[%c0_18, %c0_19], %46 {strides = array<i32>} : memref<2x128xf32, #tpu.memory_space<vmem>>, vector<2x128xf32>,
    return
  }
  func.func @transform_0(%arg0: i32) -> (i32, i32) {
    %c0_i32 = arith.constant 0 : i32
    %c0_i32_0 = arith.constant 0 : i32
    return %arg0, %c0_i32 : i32, i32
  }
  func.func @transform_1(%arg0: i32) -> (i32, i32) {
    %c0_i32 = arith.constant 0 : i32
    %c0_i32_0 = arith.constant 0 : i32
    %c0_i32_1 = arith.constant 0 : i32
    return %c0_i32, %c0_i32_0 : i32, i32
  }
  func.func @transform_2(%arg0: i32) -> (i32, i32) {
    %c0_i32 = arith.constant 0 : i32
    %c0_i32_0 = arith.constant 0 : i32
    %c0_i32_1 = arith.constant 0 : i32
    return %c0_i32, %c0_i32_0 : i32, i32
  }
  func.func @transform_3(%arg0: i32) -> (i32, i32) {
    %c0_i32 = arith.constant 0 : i32
    %c0_i32_0 = arith.constant 0 : i32
    return %arg0, %c0_i32 : i32, i32
  }
}

</mosaic_0001>

<bundles_post_ra>
// kernel: tpu_custom_call.1
= control target key start
LH: loop header
LB: loop body
LE: loop exit
PB: predicated region body
PF: predicated region fallthrough
CT: control target
= control target key end

     0   :  { %8 = vsyncpa [#allocation3], 0  ;;  %s596_s0 = inlined_call_operand.hbm [shape: f32[16,32], index: 0, kind: input, shape index: {}]   ;;  %s597_s1 = inlined_call_operand.hbm [shape: f32[96,128], index: 1, kind: input, shape index: {}]   ;;  %s598_s2 = inlined_call_operand.vmem [shape: f32[1,128], index: 2, kind: input, shape index: {}]   ;;  %s599_s3 = inlined_call_operand.hbm [shape: f32[2,128], index: 3, kind: output, shape index: {}]  }
   0x1   :  { %9 = vsyncpa [#allocation6], 0 }
   0x2   :  { %10 = vsyncpa [#allocation4], 0  ;;  %s531_s12 = smov [#allocation2]  }
   0x3   :  { %s16_s13 = sshll.u32 %s531_s12, 4  ;;  %s17_s13 = int_to_ptr.vmem [resolvable:$true] %s16_s13 }
   0x4   :  { %s473_s14 = scalar_lea.vmem %s17_s13, 256  ;;  %p478_p1 = scmp.lt.s32.totalorder %s17_s13, %s17_s13 }
   0x5   :  { %p474_p0 = scmp.ne.s32.totalorder %s17_s13, %s473_s14  ;;  %p479_p2 = scmp.lt.s32.totalorder %s473_s14, %s473_s14 }
   0x7   :  { %p480_p3 = por %p479_p2, %p478_p1 }
   0x9   :  { %p481_p4 = pnand %p480_p3, %p474_p0 }
   0xb   :  { %484 = shalt.err (!%p481_p4)
}
   0xc   :  { %s532_s15 = smov 128   ;;  %s533_s16 = smov 8  }
   0xd   :  { %22 = dma.hbm_to_vmem [thread:$0]  %s596_s0, 256, %s17_s13, [#allocation3], %s532_s15, %s532_s15, %s533_s16  }
   0xe   :  { %s534_s19 = smov [#allocation5]  }
   0xf   :  { %s28_s20 = sshll.u32 %s534_s19, 4  ;;  %s29_s20 = int_to_ptr.vmem [resolvable:$true] %s28_s20 }
  0x10   :  { %s493_s21 = scalar_lea.vmem %s29_s20, 1536  ;;  %p498_p6 = scmp.lt.s32.totalorder %s29_s20, %s29_s20 }
  0x11   :  { %p494_p5 = scmp.ne.s32.totalorder %s29_s20, %s493_s21  ;;  %p499_p7 = scmp.lt.s32.totalorder %s493_s21, %s493_s21 }
  0x13   :  { %p500_p8 = por %p499_p7, %p498_p6 }
  0x15   :  { %p501_p9 = pnand %p500_p8, %p494_p5 }
  0x17   :  { %504 = shalt.err (!%p501_p9)
}
  0x18   :  { %34 = dma.hbm_to_vmem [thread:$0]  %s597_s1, 1536, %s29_s20, [#allocation6], %s532_s15, %s532_s15, %s533_s16  }
  0x19   :  { %525 = dma.done.wait [#allocation3], 256  }
  0x1a   :  { %526 = vsyncadd [#allocation3], 4294967040 }
  0x1b   :  { %527 = dma.done.wait [#allocation6], 1536  }
  0x1c   :  { %528 = vsyncadd [#allocation6], 4294965760  ;;  %v47_v0 = vlaneseq  ;;  %v105_v3 = vld [vmem:[#allocation5 + $0x18] sm:$0xff]  ;;  %v104_v5 = vld [vmem:[#allocation5 + $0x10] sm:$0xff]  ;;  %vm106_vm4 = vcmask 261120   ;;  %s535_s24 = smov [#allocation7]  }
  0x1d   :  { %v101_v4 = vld [vmem:[#allocation5 + $0x38] sm:$0xff]  ;;  %427 = vmatprep.subr.mxu0 %v105_v3  ;;  %v100_v8 = vld [vmem:[#allocation5 + $0x30] sm:$0xff]  ;;  %v103_v9 = vld [vmem:[#allocation5 + $0x8] sm:$0xff]  ;;  %s392_s25 = sshll.u32 %s535_s24, 4  ;;  %vm382_vm7 = vcmask 1041409   ;;  %s393_s25 = int_to_ptr.vmem [resolvable:$true] %s392_s25 }
  0x1e   :  { %v48_v1 = vshrl.u32 %v47_v0, 7  ;;  %438 = vmatprep.subr.mxu1 %v101_v4  ;;  %428 = vmatpush3.msra.mxu0 %v105_v3  ;;  %v99_v10 = vld [vmem:[#allocation5 + $0x28] sm:$0xff]  ;;  %v43_v11 = vld [vmem:[#allocation2] sm:$0xff]  ;;  %v44_v12 = vld [vmem:[#allocation2 + $0x8] sm:$0xff]  ;;  %s505_s26 = scalar_lea.vmem %s393_s25, 32  ;;  %p510_p11 = scmp.lt.s32.totalorder %s393_s25, %s393_s25 }
  0x1f   :  { %439 = vmatpush3.msra.mxu1 %v101_v4  ;;  %429 = vmatprep.subr.mxu0 %v104_v5  ;;  %v45_v13 = vrot.slane %v43_v11, 7  ;;  %v52_v14 = vrot.slane %v43_v11, 1  ;;  %v102_v15 = vld [vmem:[#allocation5] sm:$0xff]  ;;  %v46_v17 = vrot.slane %v44_v12, 7  ;;  %v53_v20 = vrot.slane %v44_v12, 1  ;;  %v272_v27 = vld [vmem:[#allocation5 + $0x58] sm:$0xff]  ;;  %p506_p10 = scmp.ne.s32.totalorder %s393_s25, %s505_s26  ;;  %p511_p12 = scmp.lt.s32.totalorder %s505_s26, %s505_s26 }
  0x20   :  { %v57_v2 = vadd.s32 8, %v48_v1  ;;  %v62_v6 = vand.u32 7, %v48_v1  ;;  %440 = vmatprep.subr.mxu1 %v100_v8  ;;  %vm49_vm0 = vcmp.lt.s32.totalorder %v48_v1, 1  ;;  %vm54_vm1 = vcmp.lt.s32.totalorder %v48_v1, 7  ;;  %430 = vmatpush3.msra.mxu0 %v104_v5  ;;  %v98_v16 = vld [vmem:[#allocation5 + $0x20] sm:$0xff]  ;;  %v271_v29 = vld [vmem:[#allocation5 + $0x50] sm:$0xff] }
  0x21   :  { %441 = vmatpush3.msra.mxu1 %v100_v8  ;;  %431 = vmatprep.subr.mxu0 %v103_v9  ;;  %v51_v22 = vsel %vm49_vm0, %v46_v17, %v45_v13  ;;  %v50_v23 = vsel %vm49_vm0, %v45_v13, %v46_v17  ;;  %v55_v24 = vsel %vm54_vm1, %v52_v14, %v53_v20  ;;  %v270_v30 = vld [vmem:[#allocation5 + $0x48] sm:$0xff]  ;;  %v269_v32 = vld [vmem:[#allocation5 + $0x40] sm:$0xff]  ;;  %v408_v53 = vld [vmem:[%s598_s2] ss:$0 sm:$0xff]  ;;  %p512_p13 = por %p511_p12, %p510_p11 }
  0x22   :  { %v69_v7 = vand.u32 7, %v57_v2  ;;  %vm562_vm2 = vcmp.eq.s32.totalorder %v62_v6, 0  ;;  %442 = vmatprep.subr.mxu1 %v99_v10  ;;  %vm570_vm5 = vcmp.eq.s32.totalorder %v62_v6, 7  ;;  %432 = vmatpush3.msra.mxu0 %v103_v9  ;;  %v56_v31 = vsel %vm54_vm1, %v53_v20, %v52_v14 }
  0x23   :  { %443 = vmatpush3.msra.mxu1 %v99_v10  ;;  %433 = vmatprep.subr.mxu0 %v102_v15  ;;  %v88_v25 = vsel %vm562_vm2, 0.0, %v51_v22  ;;  %v96_v28 = vsel %vm570_vm5, 0.0, %v55_v24  ;;  %p513_p0 = pnand %p512_p13, %p506_p10 }
  0x24   :  { %vm566_vm3 = vcmp.eq.s32.totalorder %v69_v7, 0  ;;  %444 = vmatprep.subr.mxu1 %v98_v16  ;;  %434 = vmatpush3.msra.mxu0 %v102_v15  ;;  %vm91_vm6 = vcmp.eq.s32.totalorder %v69_v7, 7 }
  0x25   :  { %v89_v26 = vsel %vm566_vm3, 0.0, %v50_v23  ;;  %435 = vmatprep.mubr.msk.f32.mxu0 %vm106_vm4, %v88_v25  ;;  %445 = vmatpush3.msra.mxu1 %v98_v16  ;;  %v97_v33 = vsel %vm91_vm6, 0.0, %v56_v31 }
  0x26   :  { %446 = vmatprep.mubr.msk.f32.mxu1 %vm106_vm4, %v43_v11  ;;  %436 = vmatmul.mubr.msk.f32.vlgmr.msra.gmra.mxu0 %vm106_vm4, %v89_v26 }
  0x27   :  { %447 = vmatmul.mubr.msk.f32.vlgmr.msra.gmra.mxu1 %vm106_vm4, %v44_v12  ;;  %449 = vmatprep.subr.mxu0 %v272_v27 }
  0x28   :  { %457 = vmatprep.mubr.msk.f32.mxu0 %vm106_vm4, %v96_v28  ;;  %450 = vmatpush3.msra.mxu0 %v272_v27 }
  0x29   :  { %451 = vmatprep.subr.mxu0 %v271_v29 }
  0x2a   :  { %452 = vmatpush3.msra.mxu0 %v271_v29 }
  0x2b   :  { %453 = vmatprep.subr.mxu0 %v270_v30 }
  0x2c   :  { %454 = vmatpush3.msra.mxu0 %v270_v30 }
  0x2d   :  { %455 = vmatprep.subr.mxu0 %v269_v32 }
  0x2e   :  { %456 = vmatpush3.msra.mxu0 %v269_v32 }
  0x2f   :  { %458 = vmatmul.mubr.msk.f32.vlgmr.msra.gmra.mxu0 %vm106_vm4, %v97_v33 }
  0xe6   :  { %v437_v34 = vpop.f32.mrf.mxu0 }
  0xe7   :  { %v448_v35 = vpop.f32.mrf.mxu1 }
  0xe8   :  { %v179_v36 = vpop.f32.mrf.mxu0  ;;  %v266_v38 = vadd.f32 %v448_v35, %v437_v34 }
  0xe9   :  { %v260_v37 = vpop.f32.mrf.mxu1 }
  0xea   :  { %v261_v40 = vadd.f32 %v260_v37, %v179_v36 }
  0xef   :  { %v459_v39 = vpop.f32.mrf.mxu0 }
  0xf0   :  { %v355_v41 = vadd.f32 %v459_v39, %v266_v38 }
  0xf1   :  { %v345_v42 = vpop.f32.mrf.mxu0 }
  0xf2   :  { %v362_v43 = vrot.slane %v355_v41, 4  ;;  %v354_v44 = vadd.f32 %v345_v42, %v261_v40 }
  0xf4   :  { %v363_v45 = vmax.f32 %v355_v41, %v362_v43  ;;  %v356_v46 = vrot.slane %v354_v44, 4 }
  0xf6   :  { %v364_v47 = vrot.slane %v363_v45, 2  ;;  %v357_v48 = vmax.f32 %v354_v44, %v356_v46 }
  0xf8   :  { %v365_v49 = vmax.f32 %v363_v45, %v364_v47  ;;  %v358_v50 = vrot.slane %v357_v48, 2 }
  0xfa   :  { %v366_v51 = vrot.slane %v365_v49, 1  ;;  %v359_v52 = vmax.f32 %v357_v48, %v358_v50 }
  0xfc   :  { %v367_v54 = vmax.f32 %v365_v49, %v366_v51  ;;  %v360_v55 = vrot.slane %v359_v52, 1 }
  0xfe   :  { %v361_v56 = vmax.f32 %v359_v52, %v360_v55  ;;  %v376_v57 = vadd.f32 %v408_v53, %v367_v54 }
 0x100   :  { %v375_v58 = vadd.f32 %v408_v53, %v361_v56  ;;  %v378_v59 = vmax.f32 %v376_v57, 0.0 }
 0x102   :  { %v377_v60 = vmax.f32 %v375_v58, 0.0  ;;  %v381_v61 = vrot.slane %v378_v59, 7 }
 0x104   :  { %v383_v62 = vsel %vm382_vm7, %v381_v61, %v377_v60 }
 0x105   :  { %385 = vst [vmem:[#allocation7] sm:$0x3] %v383_v62 }
 0x106   :  { %516 = shalt.err (!%p513_p0)
}
 0x107   :  { %395 = dma.vmem_to_hbm [thread:$0]  %s393_s25, 32, %s599_s3, [#allocation4]  }
 0x108   :  { %529 = dma.done.wait [#allocation4], 32  }
 0x109   :  { %530 = vsyncadd [#allocation4], 4294967264 }
 0x10a   :  { %399 = vsyncpa [#allocation3], 1 }
 0x10b   :  { %400 = vsyncpa [#allocation6], 1 }
 0x10c   :  { %401 = vsyncpa [#allocation4], 1 }

</bundles_post_ra>
